<compile_context>
chip_gen: v6e
topology: v6e:2x2x1
jax: 0.10.0
libtpu: 0.0.40
codegen_flags: <defaults>
</compile_context>

<pallas_src>
import jax
import jax.numpy as jnp
from jax.experimental import pallas as pl
from jax.experimental.pallas import tpu as pltpu


def ar_kernel(params_ref, x_ref, o_ref):
    """params_ref: (W+1, 1) f32 VMEM  [w_0..w_{W-1}, bias];
    x_ref: (TB, W, TD) VMEM;  o_ref: (TB, TD) VMEM."""
    W = x_ref.shape[1]
    w = params_ref[0:W, :].reshape(1, W, 1)   # per-sublane weights, lane-replicated
    b = params_ref[W:W + 1, :]                # (1, 1) bias
    x = x_ref[...].astype(jnp.float32)        # one dense (TB, W, TD) load, f32 accum
    acc = jnp.sum(x * w, axis=1)              # sublane (W) reduce -> (TB, TD)
    o_ref[...] = (acc + b).astype(o_ref.dtype)


# Per-generation tuning: (target x-tile bytes, vmem_limit_bytes, min grid blocks)
_GEN_CONFIG = {
    "v5e": (4 << 20, 32 << 20, 3),      # 820 GB/s: 4 MiB tiles already hide overhead
    "v6e": (12 << 20, 64 << 20, 3),     # 128 MiB VMEM: bigger tiles, higher limit
    "v7x": (10 << 20, 44 << 20, 4),     # 64 MiB VMEM, 2 TCs: >=4 blocks, stay <64 MiB
    "unknown": (6 << 20, 40 << 20, 3),  # conservative: safe on every generation
}


def _tpu_generation():
    try:
        kind = jax.devices()[0].device_kind.lower()
    except Exception:
        return "unknown"
    if "v5 lite" in kind or "v5e" in kind or "v5lite" in kind:
        return "v5e"
    if "v6" in kind:
        return "v6e"
    if "v7" in kind:
        return "v7x"
    return "unknown"


def _choose_tiles(B, W, D, itemsize, target_bytes, min_blocks):
    """Jointly pick (TB, TD): x tile ~= target_bytes, output block sublane/lane
    aligned, and enough blocks to pipeline / use both TensorCores."""
    sub = max(8, 32 // itemsize)               # sublane multiple for this dtype
    tb_min = B if B < sub else sub

    # ---- lane (D) tile ------------------------------------------------
    if D < 256 or W * D * itemsize * tb_min <= target_bytes:
        # Full-D blocks: densest DMAs / lane-dense stores.  (If D < 128 the
        # tile pads to 128 lanes; unavoidable, block must equal full D.)
        td = D
    else:
        td = max(128, (target_bytes // (W * itemsize * tb_min)) // 128 * 128)
        if td >= D:
            td = D

    # ---- sublane (B) tile ---------------------------------------------
    tb_cap = max(1, target_bytes // (W * td * itemsize))
    if tb_cap >= B:
        tb = B
    elif tb_cap >= sub:
        tb = (tb_cap // sub) * sub
    else:
        tb = tb_min

    # ---- ensure enough blocks to pipeline / shard, but never split a
    #      tiny problem just to have a grid ------------------------------
    total_bytes = B * W * D * itemsize
    if total_bytes >= (2 << 20):
        nd = pl.cdiv(D, td)
        if nd * pl.cdiv(B, tb) < min_blocks and tb > sub:
            want_b = pl.cdiv(min_blocks, nd)
            tb2 = max(sub, ((pl.cdiv(B, want_b) + sub - 1) // sub) * sub)
            if pl.cdiv(B, tb2) * nd >= min_blocks:
                tb = tb2
        if nd * pl.cdiv(B, tb) < min_blocks and td > 128 and D >= 256:
            want_d = pl.cdiv(min_blocks, pl.cdiv(B, tb))
            td2 = max(128, ((pl.cdiv(D, want_d) + 127) // 128) * 128)
            if pl.cdiv(B, tb) * pl.cdiv(D, td2) >= min_blocks:
                td = td2
    return tb, td


@jax.jit
def ar_forward(x, weight, bias):
    """x: (B, W, D), weight: (1, W), bias: (1,) -> (B, 1, D)."""
    B, W, D = x.shape
    itemsize = x.dtype.itemsize

    target_bytes, vmem_limit, min_blocks = _GEN_CONFIG[_tpu_generation()]
    TB, TD = _choose_tiles(B, W, D, itemsize, target_bytes, min_blocks)
    grid = (pl.cdiv(B, TB), pl.cdiv(D, TD))

    # Weights + bias as a tiny f32 VMEM column: rows 0..W-1 = weight, row W = bias.
    params = jnp.concatenate(
        [weight.reshape(-1), bias.reshape(-1)]
    ).astype(jnp.float32).reshape(W + 1, 1)

    out2d = pl.pallas_call(
        ar_kernel,
        out_shape=jax.ShapeDtypeStruct((B, D), x.dtype),
        grid=grid,
        in_specs=[
            pl.BlockSpec((W + 1, 1), lambda b, d: (0, 0)),      # fetched once
            pl.BlockSpec((TB, W, TD), lambda b, d: (b, 0, d)),
        ],
        out_specs=pl.BlockSpec((TB, TD), lambda b, d: (b, d)),
        compiler_params=pltpu.CompilerParams(
            dimension_semantics=("parallel", "parallel"),
            vmem_limit_bytes=vmem_limit,
        ),
    )(params, x)

    # (B, 1, D) restored with a free reshape in the wrapper.
    return out2d.reshape(B, 1, D)


if __name__ == "__main__":
    key = jax.random.PRNGKey(0)
    kx, kw, kb, kx2, kx3 = jax.random.split(key, 5)

    def reference(x, weight, bias):
        xf = x.astype(jnp.float32)
        wf = weight.astype(jnp.float32).reshape(1, -1, 1)
        bf = bias.astype(jnp.float32)[None, :, None]
        return jnp.sum(xf * wf, axis=1, keepdims=True) + bf

    W = 8
    weight = jax.random.normal(kw, (1, W), dtype=jnp.float32) * 0.1
    bias = jax.random.normal(kb, (1,), dtype=jnp.float32) * 0.1

    # --- test 1: module-sized shapes (batch=2, window=8, features=32) ---
    B, D = 2, 32
    x = jax.random.normal(kx, (B, W, D), dtype=jnp.float32)
    out = jax.block_until_ready(ar_forward(x, weight, bias))
    assert out.shape == (B, 1, D)
    assert jnp.allclose(out, reference(x, weight, bias), atol=1e-5, rtol=1e-5)

    # --- test 2: non-divisible B, exercises batch tiling + partial blocks ---
    B2, D2 = 21, 4096
    x2 = jax.random.normal(kx2, (B2, W, D2), dtype=jnp.float32)
    out2 = jax.block_until_ready(ar_forward(x2, weight, bias))
    assert out2.shape == (B2, 1, D2)
    assert jnp.allclose(out2, reference(x2, weight, bias), atol=1e-4, rtol=1e-4)

    # --- test 3: bf16 activations (bandwidth-optimal input), f32 accumulate ---
    B3, D3 = 5, 256
    x3 = jax.random.normal(kx3, (B3, W, D3), dtype=jnp.float32).astype(jnp.bfloat16)
    out3 = jax.block_until_ready(ar_forward(x3, weight, bias))
    assert out3.shape == (B3, 1, D3)
    assert jnp.allclose(out3.astype(jnp.float32),
                        reference(x3.astype(jnp.float32), weight, bias),
                        atol=2e-2, rtol=2e-2)

    print("KERNEL_OK")
</pallas_src>

<mosaic_0001>
module attributes {stable_mosaic.version = 11 : i64} {
  func.func @ar_kernel(%arg0: i32, %arg1: i32, %arg2: memref<9x1xf32, #tpu.memory_space<vmem>>, %arg3: memref<2x8x32xf32, #tpu.memory_space<vmem>>, %arg4: memref<2x32xf32, #tpu.memory_space<vmem>>) attributes {dimension_semantics = [#tpu.dimension_semantics<parallel>, #tpu.dimension_semantics<parallel>], iteration_bounds = array<i64: 1, 1>, scalar_prefetch = 0 : i64, scratch_operands = 0 : i64, tpu.core_type = #tpu.core_type<tc>, window_params = [{pipeline_mode = #tpu.pipeline_mode<synchronous>, transform_indices = @transform_0, window_bounds = array<i64: 9, 1>}, {transform_indices = @transform_1, window_bounds = array<i64: 2, 8, 32>}, {transform_indices = @transform_2, window_bounds = array<i64: 2, 32>}]} {
    %c0 = arith.constant 0 : index
    %c0_0 = arith.constant 0 : index
    %0 = vector.load %arg2[%c0, %c0_0] : memref<9x1xf32, #tpu.memory_space<vmem>>, vector<8x1xf32>
    %1 = vector.shape_cast %0 : vector<8x1xf32> to vector<1x8x1xf32>
    %c8 = arith.constant 8 : index
    %c0_1 = arith.constant 0 : index
    %2 = vector.load %arg2[%c8, %c0_1] : memref<9x1xf32, #tpu.memory_space<vmem>>, vector<1x1xf32>
    %c0_2 = arith.constant 0 : index
    %c0_3 = arith.constant 0 : index
    %c0_4 = arith.constant 0 : index
    %3 = vector.load %arg3[%c0_2, %c0_3, %c0_4] : memref<2x8x32xf32, #tpu.memory_space<vmem>>, vector<2x8x32xf32>
    %4 = vector.broadcast %1 : vector<1x8x1xf32> to vector<2x8x32xf32>
    %5 = arith.mulf %3, %4 : vector<2x8x32xf32>
    %cst = arith.constant dense<0.000000e+00> : vector<2x32xf32>
    %6 = vector.multi_reduction <add>, %5, %cst [1] : vector<2x8x32xf32> to vector<2x32xf32>
    %7 = vector.broadcast %2 : vector<1x1xf32> to vector<2x32xf32>
    %8 = arith.addf %6, %7 : vector<2x32xf32>
    %c0_5 = arith.constant 0 : index
    %c0_6 = arith.constant 0 : index
    %9 = vector.load %arg4[%c0_5, %c0_6] : memref<2x32xf32, #tpu.memory_space<vmem>>, vector<2x32xf32>
    tpu.vector_store %arg4[%c0_5, %c0_6], %8 {strides = array<i32>} : memref<2x32xf32, #tpu.memory_space<vmem>>, vector<2x32xf32>,
    return
  }
  func.func @transform_0(%arg0: i32, %arg1: i32) -> (i32, i32) {
    %c0_i32 = arith.constant 0 : i32
    %c0_i32_0 = arith.constant 0 : i32
    %c0_i32_1 = arith.constant 0 : i32
    return %c0_i32, %c0_i32_0 : i32, i32
  }
  func.func @transform_1(%arg0: i32, %arg1: i32) -> (i32, i32, i32) {
    %c0_i32 = arith.constant 0 : i32
    %c0_i32_0 = arith.constant 0 : i32
    return %arg0, %c0_i32, %arg1 : i32, i32, i32
  }
  func.func @transform_2(%arg0: i32, %arg1: i32) -> (i32, i32) {
    %c0_i32 = arith.constant 0 : i32
    return %arg0, %arg1 : i32, i32
  }
}

</mosaic_0001>

<bundles_post_ra>
// kernel: ar_forward.1
= control target key start
LH: loop header
LB: loop body
LE: loop exit
PB: predicated region body
PF: predicated region fallthrough
CT: control target
= control target key end

     0   :  { %v92_v2 = vmov 0   ;;  %s124_s0 = inlined_call_operand.vmem [shape: f32[9,1], index: 0, kind: input, shape index: {}]   ;;  %s125_s1 = inlined_call_operand.vmem [shape: f32[2,8,32], index: 1, kind: input, shape index: {}]   ;;  %s126_s2 = inlined_call_operand.hbm [shape: f32[2,32], index: 2, kind: output, shape index: {}]  }
   0x1   :  { %v12_v0 = vld [vmem:[%s124_s0] sm:$0xff]  ;;  %v13_v1 = vld [vmem:[%s124_s0 + $0x8] sm:$0x1]  ;;  %69 = vset.pattern.permute.xlu0 %v92_v2 }
   0x2   :  { %65 = vpush %v13_v1 }
   0x3   :  { %7 = vsyncpa [#allocation3], 0  ;;  %18 = vperm.xlu0 %69, %v12_v0   ;;  %v14_v3 = vld [vmem:[%s125_s1] sm:$0xff]  ;;  %v15_v4 = vld [vmem:[%s125_s1 + $0x8] sm:$0xff]  ;;  %vm23_vm0 = vcmask 261120   ;;  %s93_s1 = smov [#allocation2]  }
   0x4   :  { %s57_s17 = sshll.u32 %s93_s1, 4  ;;  %vm46_vm1 = vcmask 1041409   ;;  %vm49_vm2 = vcmask 254976   ;;  %s58_s17 = int_to_ptr.vmem [resolvable:$true] %s57_s17 }
   0x5   :  { %s70_s18 = scalar_lea.vmem %s58_s17, 32  ;;  %p75_p1 = scmp.lt.s32.totalorder %s58_s17, %s58_s17 }
   0x6   :  { %p71_p0 = scmp.ne.s32.totalorder %s58_s17, %s70_s18  ;;  %p76_p2 = scmp.lt.s32.totalorder %s70_s18, %s70_s18 }
   0x8   :  { %p77_p3 = por %p76_p2, %p75_p1 }
   0xa   :  { %p78_p4 = pnand %p77_p3, %p71_p0 }
  0x33   :  { %s66_s0 = spop %65 }
  0x34   :  { %v40_v20 = vstv %s66_s0 }
  0x7e   :  { %v19_v5 = vpop.permute.xlu0 %18 }
  0x7f   :  { %v21_v6 = vmul.f32 %v19_v5, %v14_v3  ;;  %v22_v7 = vmul.f32 %v19_v5, %v15_v4 }
  0x81   :  { %v24_v8 = vsel %vm23_vm0, %v21_v6, 0.0  ;;  %v31_v9 = vsel %vm23_vm0, %v22_v7, 0.0 }
  0x82   :  { %v25_v10 = vrot.slane %v24_v8, 4  ;;  %v32_v11 = vrot.slane %v31_v9, 4 }
  0x84   :  { %v26_v12 = vadd.f32 %v25_v10, %v24_v8  ;;  %v33_v13 = vadd.f32 %v32_v11, %v31_v9 }
  0x86   :  { %v27_v14 = vrot.slane %v26_v12, 2  ;;  %v34_v15 = vrot.slane %v33_v13, 2 }
  0x88   :  { %v28_v16 = vadd.f32 %v27_v14, %v26_v12  ;;  %v35_v17 = vadd.f32 %v34_v15, %v33_v13 }
  0x8a   :  { %v29_v18 = vrot.slane %v28_v16, 1  ;;  %v36_v19 = vrot.slane %v35_v17, 1 }
  0x8c   :  { %v30_v21 = vadd.f32 %v29_v18, %v28_v16  ;;  %v37_v22 = vadd.f32 %v36_v19, %v35_v17 }
  0x8e   :  { %v42_v23 = vadd.f32 %v40_v20, %v30_v21  ;;  %v43_v24 = vadd.f32 %v40_v20, %v37_v22 }
  0x90   :  { %v47_v25 = vsel %vm46_vm1, %v43_v24, %v42_v23 }
  0x91   :  { %50 = vst.msk [vmem:[#allocation2] sm:$0x3] %vm49_vm2, %v47_v25 }
  0x92   :  { %81 = shalt.err (!%p78_p4)
}
  0x93   :  { %60 = dma.vmem_to_hbm [thread:$0]  %s58_s17, 32, %s126_s2, [#allocation3]  }
  0x94   :  { %90 = dma.done.wait [#allocation3], 32  }
  0x95   :  { %91 = vsyncadd [#allocation3], 4294967264 }
  0x96   :  { %64 = vsyncpa [#allocation3], 1 }

</bundles_post_ra>
